<compile_context>
chip_gen: v7x
topology: tpu7x:2x2x1
jax: 0.10.0
libtpu: 0.0.40
codegen_flags: <defaults>
</compile_context>

<pallas_src>
import functools

import jax
import jax.numpy as jnp
from jax.experimental import pallas as pl
from jax.experimental.pallas import tpu as pltpu


# (d-parity, h-parity) order used by the kernel loop, and the matching pair of
# original x0..x7 chunk indices (wp=0 chunk, wp=1 chunk) from the PyTorch concat
# order: x0=(0,0,0) x1=(1,0,0) x2=(0,1,0) x3=(0,0,1) x4=(0,1,1) x5=(1,0,1)
#        x6=(1,1,0) x7=(1,1,1)   (parities are (d, h, w)).
_DP_HP_ORDER = ((0, 0), (1, 0), (0, 1), (1, 1))
_CHUNK_PAIRS = ((0, 3), (1, 5), (2, 4), (6, 7))


def pack_reduction_weight(weight):
    """Pack nn.Linear(8C, 2C, bias=False).weight (shape (2C, 8C)) into the
    (4, 2C, 2C_out) contraction blocks used by the kernel.  Do this ONCE
    (outside the per-forward hot path)."""
    two_c_out, eight_c = weight.shape
    c = eight_c // 8
    assert eight_c == 8 * c
    w_t = weight.T                                  # (8C, 2C_out), K-major for MXU
    chunks = [w_t[k * c:(k + 1) * c] for k in range(8)]
    blocks = [jnp.concatenate([chunks[a], chunks[b]], axis=0)   # (2C, 2C_out)
              for (a, b) in _CHUNK_PAIRS]
    return jnp.stack(blocks, axis=0)                # (4, 2C, 2C_out)


def _round_up(v, m):
    return ((v + m - 1) // m) * m


def _vmem_capacity_bytes():
    """Physical VMEM per TensorCore; conservative fallback if the query fails."""
    try:
        info = pltpu.get_tpu_info()
        for attr in ("vmem_capacity_bytes", "vmem_bytes", "vmem_size_bytes"):
            v = getattr(info, attr, None)
            if v:
                return int(v)
    except Exception:
        pass
    return 64 * 1024 * 1024          # v7x per-TC VMEM (smallest of the targets)


def _merge_reduce_norm_kernel(x_ref, w_ref, g_ref, b_ref, o_ref, *, eps, mm_dtype):
    # x_ref: (2, th, 2, tw, 2C)   -> (d-parity, h2, h-parity, w2, wp*C)
    # w_ref: (4, 2C, 2C_out)      -> per-(d-parity, h-parity) contraction block
    # g_ref, b_ref: (1, 2C_out)   -> LayerNorm affine (f32)
    # o_ref: (th, tw, 2C_out)
    _, th, _, tw, c2_in = x_ref.shape
    c2_out = o_ref.shape[-1]
    t = th * tw

    acc = None
    for j, (dp, hp) in enumerate(_DP_HP_ORDER):
        # tw is sublane-aligned (see wrapper) -> this flatten is a free retile.
        xj = x_ref[dp, :, hp, :, :].reshape(t, c2_in).astype(mm_dtype)
        part = jnp.dot(xj, w_ref[j], preferred_element_type=jnp.float32)
        acc = part if acc is None else acc + part            # f32 accumulation

    # LayerNorm over channels (biased variance, matches torch.nn.LayerNorm).
    # Reuse `acc` for the centered value; fold rsqrt*gamma into one multiply.
    mean = jnp.mean(acc, axis=-1, keepdims=True)
    acc = acc - mean
    var = jnp.mean(acc * acc, axis=-1, keepdims=True)
    y = acc * (jax.lax.rsqrt(var + eps) * g_ref[...]) + b_ref[...]
    o_ref[...] = y.reshape(th, tw, c2_out).astype(o_ref.dtype)


def patch_merging_3d(x, input_resolution, w_blocks, gamma, beta, *,
                     eps=1e-5,
                     matmul_dtype=jnp.bfloat16,
                     vmem_limit_bytes=None):
    """PatchMerging3D forward.

    x:        (B, D*H*W, C)          activations (f32 or bf16)
    w_blocks: (4, 2C, 2C_out)        from pack_reduction_weight(weight)
    gamma:    (2C_out,)              LayerNorm weight
    beta:     (2C_out,)              LayerNorm bias
    matmul_dtype: operand dtype on the MXU (bf16 default; f32 = exact path)
    returns   (B, (D//2)*(H//2)*(W//2), 2C_out)
    """
    D, H, W = input_resolution
    B, L, C = x.shape
    assert L == D * H * W, "input feature has wrong size"
    assert D % 2 == 0 and H % 2 == 0 and W % 2 == 0, "resolution must be even"
    D2, H2, W2 = D // 2, H // 2, W // 2
    two_c_in = 2 * C
    assert w_blocks.shape[0] == 4 and w_blocks.shape[1] == two_c_in
    two_c_out = int(w_blocks.shape[2])

    mm_dtype = jnp.dtype(matmul_dtype if matmul_dtype is not None else x.dtype)

    # Free (row-major, metadata-only) reshape: the (M, 8C) gathered slab is
    # never materialized in HBM; the w-parity is folded into the channel dim.
    x8 = x.reshape(B * D2, 2, H2, 2, W2, two_c_in)
    w_in = w_blocks.astype(mm_dtype)
    g_in = gamma.reshape(1, two_c_out).astype(jnp.float32)
    b_in = beta.reshape(1, two_c_out).astype(jnp.float32)

    # ---- tile selection under a per-generation VMEM budget ------------------
    x_item = jnp.dtype(x.dtype).itemsize
    w_item = jnp.dtype(mm_dtype).itemsize
    out_item = x_item
    lane = 128
    sub_x = 16 if x_item == 2 else 8            # sublane granule of x's dtype
    c2i_pad = _round_up(two_c_in, lane)
    c2o_pad = _round_up(two_c_out, lane)

    if vmem_limit_bytes is None:
        vmem_limit_bytes = min(_vmem_capacity_bytes() * 3 // 4, 100 * 1024 * 1024)
    budget = vmem_limit_bytes * 8 // 10         # headroom for compiler scratch

    # Fixed-cost residents: double-buffered packed weight + LN affine.
    fixed = (2 * 4 * _round_up(two_c_in, 16 if w_item == 2 else 8) * c2o_pad * w_item
             + 4 * c2o_pad * 4)
    # Per output token (th*tw): x tile (4 parity rows, double-buffered),
    # out tile (double-buffered), f32 accumulator/LN temporaries, and the
    # matmul-dtype casts of the parity rows.
    per_tok = (2 * 4 * c2i_pad * x_item
               + 2 * c2o_pad * out_item
               + 3 * c2o_pad * 4
               + 4 * c2i_pad * w_item)
    max_tok = max(sub_x, (budget - fixed) // per_tok)

    # tw: w2-columns per block.  Keep it a sublane multiple whenever W2 allows,
    # so the in-kernel token flatten / un-flatten are free retiles.
    if W2 <= sub_x:
        tw = W2
    else:
        tw = min((W2 // sub_x) * sub_x, max(sub_x, (max_tok // sub_x) * sub_x))
    th = max(1, min(H2, max_tok // max(tw, 1)))
    if H2 % th != 0:           # prefer no masked remainder h-block when cheap
        for cand in range(th, 0, -1):
            if H2 % cand == 0:
                if 2 * cand >= th:
                    th = cand
                break
    nh = pl.cdiv(H2, th)
    nw = pl.cdiv(W2, tw)

    grid = (B * D2, nh, nw)
    kernel = functools.partial(_merge_reduce_norm_kernel, eps=eps, mm_dtype=mm_dtype)
    out4 = pl.pallas_call(
        kernel,
        out_shape=jax.ShapeDtypeStruct((B * D2, H2, W2, two_c_out), x.dtype),
        grid_spec=pltpu.PrefetchScalarGridSpec(
            num_scalar_prefetch=0,
            grid=grid,
            in_specs=[
                # x: squeeze the (b*d2) dim; take both d/h parities, th h2-rows,
                # tw w2-columns and all folded (wp, C) channels.
                pl.BlockSpec((None, 2, th, 2, tw, two_c_in),
                             lambda i, h, w: (i, 0, h, 0, w, 0)),
                # packed weight / LN affine are grid-invariant (DMA'd once).
                pl.BlockSpec((4, two_c_in, two_c_out), lambda i, h, w: (0, 0, 0)),
                pl.BlockSpec((1, two_c_out), lambda i, h, w: (0, 0)),
                pl.BlockSpec((1, two_c_out), lambda i, h, w: (0, 0)),
            ],
            out_specs=pl.BlockSpec((None, th, tw, two_c_out),
                                   lambda i, h, w: (i, h, w, 0)),
        ),
        compiler_params=pltpu.CompilerParams(
            dimension_semantics=("parallel", "parallel", "parallel"),
            vmem_limit_bytes=int(vmem_limit_bytes)),
    )(x8, w_in, g_in, b_in)

    return out4.reshape(B, D2 * H2 * W2, two_c_out)


def _reference(x, input_resolution, weight, gamma, beta, eps=1e-5):
    D, H, W = input_resolution
    B, L, C = x.shape
    xv = x.reshape(B, D, H, W, C)
    x0 = xv[:, 0::2, 0::2, 0::2, :]
    x1 = xv[:, 1::2, 0::2, 0::2, :]
    x2 = xv[:, 0::2, 1::2, 0::2, :]
    x3 = xv[:, 0::2, 0::2, 1::2, :]
    x4 = xv[:, 0::2, 1::2, 1::2, :]
    x5 = xv[:, 1::2, 0::2, 1::2, :]
    x6 = xv[:, 1::2, 1::2, 0::2, :]
    x7 = xv[:, 1::2, 1::2, 1::2, :]
    xm = jnp.concatenate([x0, x1, x2, x3, x4, x5, x6, x7], axis=-1)
    xm = xm.reshape(B, -1, 8 * C)
    y = xm @ weight.T
    mean = jnp.mean(y, axis=-1, keepdims=True)
    var = jnp.mean((y - mean) ** 2, axis=-1, keepdims=True)
    return (y - mean) / jnp.sqrt(var + eps) * gamma + beta


if __name__ == "__main__":
    key = jax.random.PRNGKey(0)
    kx, kw, kg, kb, kx2, kw2 = jax.random.split(key, 6)

    # --- Config 1: module defaults (dim=16, input_resolution=(4,4,4)) -------
    B, D, H, W, C = 2, 4, 4, 4, 16
    x = jax.random.normal(kx, (B, D * H * W, C), dtype=jnp.float32)
    weight = jax.random.normal(kw, (2 * C, 8 * C), dtype=jnp.float32) * 0.05
    gamma = 1.0 + 0.1 * jax.random.normal(kg, (2 * C,), dtype=jnp.float32)
    beta = 0.1 * jax.random.normal(kb, (2 * C,), dtype=jnp.float32)
    w_blocks = pack_reduction_weight(weight)          # one-time packing
    ref = _reference(x, (D, H, W), weight, gamma, beta)

    # Exact path (f32 MXU operands) — tight tolerance.
    out_f32 = jax.block_until_ready(
        patch_merging_3d(x, (D, H, W), w_blocks, gamma, beta,
                         matmul_dtype=jnp.float32))
    assert out_f32.shape == (B, (D // 2) * (H // 2) * (W // 2), 2 * C), out_f32.shape
    assert jnp.allclose(out_f32, ref, atol=2e-4, rtol=2e-4), float(
        jnp.max(jnp.abs(out_f32 - ref)))

    # Default hot path (bf16 MXU operands, f32 accumulation).
    out_def = jax.block_until_ready(
        patch_merging_3d(x, (D, H, W), w_blocks, gamma, beta))
    assert jnp.allclose(out_def, ref, atol=8e-2, rtol=5e-2), float(
        jnp.max(jnp.abs(out_def - ref)))

    # bf16 activations (halves HBM traffic when the producer emits bf16).
    out_bf16 = jax.block_until_ready(
        patch_merging_3d(x.astype(jnp.bfloat16), (D, H, W), w_blocks, gamma, beta))
    assert out_bf16.dtype == jnp.bfloat16
    assert jnp.allclose(out_bf16.astype(jnp.float32), ref, atol=1.5e-1, rtol=1e-1), \
        float(jnp.max(jnp.abs(out_bf16.astype(jnp.float32) - ref)))

    # --- Config 2: lane-dense channels (2C=128) + W2 not sublane-aligned ----
    # Exercises the sublane-aligned tw tiling plus a masked remainder w-block.
    Bb, Dd, Hh, Ww, Cc = 1, 2, 8, 20, 64
    x2 = jax.random.normal(kx2, (Bb, Dd * Hh * Ww, Cc), dtype=jnp.float32)
    weight2 = jax.random.normal(kw2, (2 * Cc, 8 * Cc), dtype=jnp.float32) * (8 * Cc) ** -0.5
    g2 = jnp.ones((2 * Cc,), jnp.float32)
    b2 = jnp.zeros((2 * Cc,), jnp.float32)
    wb2 = pack_reduction_weight(weight2)
    ref2 = _reference(x2, (Dd, Hh, Ww), weight2, g2, b2)
    out2 = jax.block_until_ready(
        patch_merging_3d(x2, (Dd, Hh, Ww), wb2, g2, b2))
    assert out2.shape == ref2.shape, (out2.shape, ref2.shape)
    assert jnp.allclose(out2, ref2, atol=1e-1, rtol=5e-2), float(
        jnp.max(jnp.abs(out2 - ref2)))

    print("KERNEL_OK")
</pallas_src>

<mosaic_0001>
module attributes {stable_mosaic.version = 11 : i64} {
  func.func @_merge_reduce_norm_kernel(%arg0: i32, %arg1: i32, %arg2: i32, %arg3: memref<1x2x2x2x2x32xf32, #tpu.memory_space<vmem>>, %arg4: memref<4x32x32xf32, #tpu.memory_space<vmem>>, %arg5: memref<1x32xf32, #tpu.memory_space<vmem>>, %arg6: memref<1x32xf32, #tpu.memory_space<vmem>>, %arg7: memref<1x2x2x32xf32, #tpu.memory_space<vmem>>) attributes {dimension_semantics = [#tpu.dimension_semantics<parallel>, #tpu.dimension_semantics<parallel>, #tpu.dimension_semantics<parallel>], iteration_bounds = array<i64: 4, 1, 1>, scalar_prefetch = 0 : i64, scratch_operands = 0 : i64, tpu.core_type = #tpu.core_type<tc>, window_params = [{transform_indices = @transform_0, window_bounds = array<i64: 1, 2, 2, 2, 2, 32>}, {pipeline_mode = #tpu.pipeline_mode<synchronous>, transform_indices = @transform_1, window_bounds = array<i64: 4, 32, 32>}, {pipeline_mode = #tpu.pipeline_mode<synchronous>, transform_indices = @transform_2, window_bounds = array<i64: 1, 32>}, {pipeline_mode = #tpu.pipeline_mode<synchronous>, transform_indices = @transform_3, window_bounds = array<i64: 1, 32>}, {transform_indices = @transform_4, window_bounds = array<i64: 1, 2, 2, 32>}]} {
    %c0 = arith.constant 0 : index
    %c0_0 = arith.constant 0 : index
    %c0_1 = arith.constant 0 : index
    %c0_2 = arith.constant 0 : index
    %c0_3 = arith.constant 0 : index
    %c0_4 = arith.constant 0 : index
    %0 = vector.load %arg3[%c0, %c0_0, %c0_1, %c0_2, %c0_3, %c0_4] : memref<1x2x2x2x2x32xf32, #tpu.memory_space<vmem>>, vector<1x1x2x1x2x32xf32>
    %1 = vector.shape_cast %0 : vector<1x1x2x1x2x32xf32> to vector<2x2x32xf32>
    %2 = vector.shape_cast %1 : vector<2x2x32xf32> to vector<4x32xf32>
    %c0_5 = arith.constant 0 : index
    %c0_6 = arith.constant 0 : index
    %c0_7 = arith.constant 0 : index
    %3 = vector.load %arg4[%c0_5, %c0_6, %c0_7] : memref<4x32x32xf32, #tpu.memory_space<vmem>>, vector<1x32x32xf32>
    %4 = vector.shape_cast %3 : vector<1x32x32xf32> to vector<32x32xf32>
    %cst = arith.constant dense<0.000000e+00> : vector<4x32xf32>
    %5 = tpu.matmul %2, %4, %cst {dimension_numbers = #tpu.dot_dimension_numbers<[1], [0], [0], [1], [0, 0, 1, 1], [], []>} : vector<4x32xf32>, vector<32x32xf32>, vector<4x32xf32> -> vector<4x32xf32>
    %c0_8 = arith.constant 0 : index
    %c1 = arith.constant 1 : index
    %c0_9 = arith.constant 0 : index
    %c0_10 = arith.constant 0 : index
    %c0_11 = arith.constant 0 : index
    %c0_12 = arith.constant 0 : index
    %6 = vector.load %arg3[%c0_8, %c1, %c0_9, %c0_10, %c0_11, %c0_12] : memref<1x2x2x2x2x32xf32, #tpu.memory_space<vmem>>, vector<1x1x2x1x2x32xf32>
    %7 = vector.shape_cast %6 : vector<1x1x2x1x2x32xf32> to vector<2x2x32xf32>
    %8 = vector.shape_cast %7 : vector<2x2x32xf32> to vector<4x32xf32>
    %c1_13 = arith.constant 1 : index
    %c0_14 = arith.constant 0 : index
    %c0_15 = arith.constant 0 : index
    %9 = vector.load %arg4[%c1_13, %c0_14, %c0_15] : memref<4x32x32xf32, #tpu.memory_space<vmem>>, vector<1x32x32xf32>
    %10 = vector.shape_cast %9 : vector<1x32x32xf32> to vector<32x32xf32>
    %cst_16 = arith.constant dense<0.000000e+00> : vector<4x32xf32>
    %11 = tpu.matmul %8, %10, %cst_16 {dimension_numbers = #tpu.dot_dimension_numbers<[1], [0], [0], [1], [0, 0, 1, 1], [], []>} : vector<4x32xf32>, vector<32x32xf32>, vector<4x32xf32> -> vector<4x32xf32>
    %12 = arith.addf %5, %11 : vector<4x32xf32>
    %c0_17 = arith.constant 0 : index
    %c0_18 = arith.constant 0 : index
    %c0_19 = arith.constant 0 : index
    %c1_20 = arith.constant 1 : index
    %c0_21 = arith.constant 0 : index
    %c0_22 = arith.constant 0 : index
    %13 = vector.load %arg3[%c0_17, %c0_18, %c0_19, %c1_20, %c0_21, %c0_22] : memref<1x2x2x2x2x32xf32, #tpu.memory_space<vmem>>, vector<1x1x2x1x2x32xf32>
    %14 = vector.shape_cast %13 : vector<1x1x2x1x2x32xf32> to vector<2x2x32xf32>
    %15 = vector.shape_cast %14 : vector<2x2x32xf32> to vector<4x32xf32>
    %c2 = arith.constant 2 : index
    %c0_23 = arith.constant 0 : index
    %c0_24 = arith.constant 0 : index
    %16 = vector.load %arg4[%c2, %c0_23, %c0_24] : memref<4x32x32xf32, #tpu.memory_space<vmem>>, vector<1x32x32xf32>
    %17 = vector.shape_cast %16 : vector<1x32x32xf32> to vector<32x32xf32>
    %cst_25 = arith.constant dense<0.000000e+00> : vector<4x32xf32>
    %18 = tpu.matmul %15, %17, %cst_25 {dimension_numbers = #tpu.dot_dimension_numbers<[1], [0], [0], [1], [0, 0, 1, 1], [], []>} : vector<4x32xf32>, vector<32x32xf32>, vector<4x32xf32> -> vector<4x32xf32>
    %19 = arith.addf %12, %18 : vector<4x32xf32>
    %c0_26 = arith.constant 0 : index
    %c1_27 = arith.constant 1 : index
    %c0_28 = arith.constant 0 : index
    %c1_29 = arith.constant 1 : index
    %c0_30 = arith.constant 0 : index
    %c0_31 = arith.constant 0 : index
    %20 = vector.load %arg3[%c0_26, %c1_27, %c0_28, %c1_29, %c0_30, %c0_31] : memref<1x2x2x2x2x32xf32, #tpu.memory_space<vmem>>, vector<1x1x2x1x2x32xf32>
    %21 = vector.shape_cast %20 : vector<1x1x2x1x2x32xf32> to vector<2x2x32xf32>
    %22 = vector.shape_cast %21 : vector<2x2x32xf32> to vector<4x32xf32>
    %c3 = arith.constant 3 : index
    %c0_32 = arith.constant 0 : index
    %c0_33 = arith.constant 0 : index
    %23 = vector.load %arg4[%c3, %c0_32, %c0_33] : memref<4x32x32xf32, #tpu.memory_space<vmem>>, vector<1x32x32xf32>
    %24 = vector.shape_cast %23 : vector<1x32x32xf32> to vector<32x32xf32>
    %cst_34 = arith.constant dense<0.000000e+00> : vector<4x32xf32>
    %25 = tpu.matmul %22, %24, %cst_34 {dimension_numbers = #tpu.dot_dimension_numbers<[1], [0], [0], [1], [0, 0, 1, 1], [], []>} : vector<4x32xf32>, vector<32x32xf32>, vector<4x32xf32> -> vector<4x32xf32>
    %26 = arith.addf %19, %25 : vector<4x32xf32>
    %cst_35 = arith.constant dense<0.000000e+00> : vector<4xf32>
    %27 = vector.multi_reduction <add>, %26, %cst_35 [1] : vector<4x32xf32> to vector<4xf32>
    %28 = vector.shape_cast %27 : vector<4xf32> to vector<4x1xf32>
    %cst_36 = arith.constant 3.200000e+01 : f32
    %29 = vector.broadcast %cst_36 : f32 to vector<4x1xf32>
    %30 = arith.divf %28, %29 : vector<4x1xf32>
    %31 = vector.broadcast %30 : vector<4x1xf32> to vector<4x32xf32>
    %32 = arith.subf %26, %31 : vector<4x32xf32>
    %33 = arith.mulf %32, %32 : vector<4x32xf32>
    %cst_37 = arith.constant dense<0.000000e+00> : vector<4xf32>
    %34 = vector.multi_reduction <add>, %33, %cst_37 [1] : vector<4x32xf32> to vector<4xf32>
    %35 = vector.shape_cast %34 : vector<4xf32> to vector<4x1xf32>
    %cst_38 = arith.constant 3.200000e+01 : f32
    %36 = vector.broadcast %cst_38 : f32 to vector<4x1xf32>
    %37 = arith.divf %35, %36 : vector<4x1xf32>
    %cst_39 = arith.constant 9.99999974E-6 : f32
    %38 = vector.broadcast %cst_39 : f32 to vector<4x1xf32>
    %39 = arith.addf %37, %38 : vector<4x1xf32>
    %40 = math.rsqrt %39 : vector<4x1xf32>
    %c0_40 = arith.constant 0 : index
    %c0_41 = arith.constant 0 : index
    %41 = vector.load %arg5[%c0_40, %c0_41] : memref<1x32xf32, #tpu.memory_space<vmem>>, vector<1x32xf32>
    %42 = vector.broadcast %40 : vector<4x1xf32> to vector<4x32xf32>
    %43 = vector.broadcast %41 : vector<1x32xf32> to vector<4x32xf32>
    %44 = arith.mulf %42, %43 : vector<4x32xf32>
    %45 = arith.mulf %32, %44 : vector<4x32xf32>
    %c0_42 = arith.constant 0 : index
    %c0_43 = arith.constant 0 : index
    %46 = vector.load %arg6[%c0_42, %c0_43] : memref<1x32xf32, #tpu.memory_space<vmem>>, vector<1x32xf32>
    %47 = vector.broadcast %46 : vector<1x32xf32> to vector<4x32xf32>
    %48 = arith.addf %45, %47 : vector<4x32xf32>
    %49 = vector.shape_cast %48 : vector<4x32xf32> to vector<2x2x32xf32>
    %c0_44 = arith.constant 0 : index
    %c0_45 = arith.constant 0 : index
    %c0_46 = arith.constant 0 : index
    %c0_47 = arith.constant 0 : index
    %50 = vector.load %arg7[%c0_44, %c0_45, %c0_46, %c0_47] : memref<1x2x2x32xf32, #tpu.memory_space<vmem>>, vector<1x2x2x32xf32>
    %51 = vector.shape_cast %50 : vector<1x2x2x32xf32> to vector<2x2x32xf32>
    %52 = vector.shape_cast %49 : vector<2x2x32xf32> to vector<1x2x2x32xf32>
    tpu.vector_store %arg7[%c0_44, %c0_45, %c0_46, %c0_47], %52 {strides = array<i32>} : memref<1x2x2x32xf32, #tpu.memory_space<vmem>>, vector<1x2x2x32xf32>,
    return
  }
  func.func @transform_0(%arg0: i32, %arg1: i32, %arg2: i32) -> (i32, i32, i32, i32, i32, i32) {
    %c0_i32 = arith.constant 0 : i32
    %c0_i32_0 = arith.constant 0 : i32
    %c0_i32_1 = arith.constant 0 : i32
    %c0_i32_2 = arith.constant 0 : i32
    return %arg0, %c0_i32, %arg1, %c0_i32_0, %arg2, %c0_i32_1 : i32, i32, i32, i32, i32, i32
  }
  func.func @transform_1(%arg0: i32, %arg1: i32, %arg2: i32) -> (i32, i32, i32) {
    %c0_i32 = arith.constant 0 : i32
    %c0_i32_0 = arith.constant 0 : i32
    %c0_i32_1 = arith.constant 0 : i32
    %c0_i32_2 = arith.constant 0 : i32
    return %c0_i32, %c0_i32_0, %c0_i32_1 : i32, i32, i32
  }
  func.func @transform_2(%arg0: i32, %arg1: i32, %arg2: i32) -> (i32, i32) {
    %c0_i32 = arith.constant 0 : i32
    %c0_i32_0 = arith.constant 0 : i32
    %c0_i32_1 = arith.constant 0 : i32
    return %c0_i32, %c0_i32_0 : i32, i32
  }
  func.func @transform_3(%arg0: i32, %arg1: i32, %arg2: i32) -> (i32, i32) {
    %c0_i32 = arith.constant 0 : i32
    %c0_i32_0 = arith.constant 0 : i32
    %c0_i32_1 = arith.constant 0 : i32
    return %c0_i32, %c0_i32_0 : i32, i32
  }
  func.func @transform_4(%arg0: i32, %arg1: i32, %arg2: i32) -> (i32, i32, i32, i32) {
    %c0_i32 = arith.constant 0 : i32
    %c0_i32_0 = arith.constant 0 : i32
    return %arg0, %arg1, %arg2, %c0_i32 : i32, i32, i32, i32
  }
}

</mosaic_0001>

<bundles_post_ra>
// kernel: tpu_custom_call.1
= control target key start
LH: loop header
LB: loop body
LE: loop exit
PB: predicated region body
PF: predicated region fallthrough
CT: control target
= control target key end

     0   :  { %9 = vsyncpa [#allocation3], 0  ;;  %s1431_s0 = inlined_call_operand.hbm [shape: f32[4,2,2,2,2,32], index: 0, kind: input, shape index: {}]   ;;  %s1432_s1 = inlined_call_operand.hbm [shape: f32[4,32,32], index: 1, kind: input, shape index: {}]   ;;  %s1433_s2 = inlined_call_operand.vmem [shape: f32[1,32], index: 2, kind: input, shape index: {}]   ;;  %s1434_s3 = inlined_call_operand.vmem [shape: f32[1,32], index: 3, kind: input, shape index: {}]   ;;  %s1435_s4 = inlined_call_operand.hbm [shape: f32[4,2,2,32], index: 4, kind: output, shape index: {}]  }
   0x1   :  { %11 = vsyncpa [#allocation3 + $0x1], 0 }
   0x2   :  { %12 = vsyncpa [#allocation6], 0 }
   0x3   :  { %13 = vsyncpa [#allocation4], 0 }
   0x4   :  { %15 = vsyncpa [#allocation4 + $0x1], 0  ;;  %s1190_s15 = smov 0   ;;  %s1192_s16 = smov 0  }
   0x5   :  { %s1194_s17 = smov 0   ;;  %s1196_s18 = smov 0  }
   0x6   :  { %s1198_s19 = smov 0   ;;  %s1200_s20 = smov 0  }
   0x7 LB: > { %s789_s21 = sadd.s32 4294967295, %s1150_s20   ;;  %s790_s22 = sadd.s32 4294967294, %s1150_s20   ;;  %s1150_s20 = sphi %s1200_s20, %s21_s20   ;;  %s1146_s19 = sphi %s1198_s19, %s1458_s19   ;;  %s1142_s18 = sphi %s1196_s18, %s1457_s18   ;;  %s1138_s17 = sphi %s1194_s17, %s1456_s17   ;;  %s1134_s16 = sphi %s1192_s16, %s1455_s16   ;;  %s1130_s15 = sphi %s1190_s15, %s1454_s15  }
   0x8   : > { %p64_p0 = scmp.ne.s32.totalorder %s1134_s16, %s1130_s15  ;;  %p1224_p1 = scmp.eq.s32.totalorder %s789_s21, 0 }
   0x9   : > { %p1228_p2 = scmp.eq.s32.totalorder %s789_s21, 3  ;;  %p161_p3 = scmp.eq.s32.totalorder %s790_s22, 3 }
   0xa   : > { %s1440_s23 = scalar_select %p1224_p1, 1, 0 }
   0xb   : > { %s1441_s24 = scalar_select %p1228_p2, 1, 0 }
   0xc   : > { %p1234_p4 = por %p1224_p1, %p64_p0  ;;  %p791_p5 = scmp.ge.s32.totalorder %s1150_s20, 1 }
   0xd   : > { %p1239_p6 = por %p161_p3, %p64_p0  ;;  %p168_p7 = scmp.lt.s32.totalorder %s1150_s20, 5 }
   0xe   : > { %s1442_s25 = scalar_select %p1234_p4, 1, 0 }
   0xf   : > { %s1443_s26 = scalar_select %p1239_p6, 1, 0 }
  0x10   : > { %p1244_p8 = pnand %p791_p5, %p168_p7  ;;  %s1152_s28 = smov [#allocation5]  }
  0x11   : > { %s180_s29 = sshll.u32 %s1152_s28, 4  ;;  %s40_s5 = sadd.s32 1, %s1146_s19  ;;  %s181_s29 = int_to_ptr.vmem [resolvable:$true] %s180_s29 }
  0x12   : > { %s1444_s27 = scalar_select %p1244_p8, 1, 0 }
  0x13   : > { %p921_p9 = pneg %p1244_p8  ;;  %s1006_s8 = scalar_lea.hbm %s1432_s1, 2048 }
  0x14   : > { %p1007_p11 = scmp.ne.s32.totalorder %s1432_s1, %s1006_s8  ;;  %p1013_p3 = scmp.lt.u32.totalorder %s1006_s8, %s1432_s1 }
  0x15   : > { %p1252_p10 = pnand %p921_p9, %p1224_p1 }
  0x17   : > { %p1008_p12 = pneg %p1252_p10 }
  0x19   : > { %p1009_p13 = pnand %p1008_p12, %p1007_p11 }
  0x1b   : > { %p1010_p0 = pneg %p1009_p13 }
  0x1d   : > { %p1015_p5 = pnand %p1013_p3, %p1010_p0 }
  0x1f   : > { %1018 = shalt.err (!%p1015_p5)
}
  0x20   : > { %s1019_s13 = scalar_lea.vmem %s181_s29, 2048  ;;  %p1027_p1 = scmp.lt.s32.totalorder %s181_s29, %s181_s29 }
  0x21   : > { %p1020_p7 = scmp.ne.s32.totalorder %s181_s29, %s1019_s13  ;;  %p1028_p4 = scmp.lt.s32.totalorder %s1019_s13, %s1019_s13 }
  0x23   : > { %p1022_p9 = pnand %p1020_p7, %p1008_p12  ;;  %p1029_p8 = por %p1028_p4, %p1027_p1 }
  0x25   : > { %p1023_p6 = pneg %p1022_p9 }
  0x27   : > { %p1030_p2 = pnand %p1029_p8, %p1023_p6 }
  0x29   : > { %1033 = shalt.err (!%p1030_p2)
}
  0x2a   : > { %s1153_s14 = smov 128   ;;  %s1154_s21 = smov 8  }
  0x2b   : > { %924 = dma.hbm_to_vmem [thread:$0]  (!%p1252_p10), %s1432_s1, 2048, %s181_s29, [#allocation6], %s1153_s14, %s1153_s14, %s1154_s21  }
  0x2c   : > { %p42_p1 = scmp.ge.s32.totalorder %s40_s5, 4  ;;  %s51_s6 = sadd.s32 1, %s1138_s17 }
  0x2d   : > { %p58_p2 = scmp.ne.s32.totalorder %s1138_s17, %s1134_s16  ;;  %p59_p4 = scmp.eq.s32.totalorder %s1150_s20, 0 }
  0x2e   : > { %s1460_s5 = smov (%p42_p1, %s40_s5), 0  ;;  %p1447_p8 = scmp.ne.s32.totalorder %s1441_s24, 0 }
  0x2f   : > { %p1279_p6 = por %p59_p4, %p58_p2  ;;  %s44_s30 = ssub.s32 %s1146_s19, %s1460_s5 }
  0x30   : > { %p1285_p11 = por %p1447_p8, %p58_p2  ;;  %p934_p12 = scmp.lt.s32.totalorder %s1150_s20, 4 }
  0x31   : > { %p49_p10 = scmp.eq.s32.totalorder %s44_s30, 0  ;;  %s200_s29 = sand.u32 1, %s1138_s17  }
  0x32   : > { %s794_s9 = sshll.u32 %s200_s29, 4  ;;  %s818_s11 = sshll.u32 %s1146_s19, 8 }
  0x33   : > { %s1294_s10 = scalar_select %p49_p10, %s1138_s17, %s51_s6  }
  0x34   : > { %s1300_s14 = scalar_lea.hbm %s1431_s0, %s818_s11  ;;  %s204_s24 = scalar_lea.vmem [#allocation2], %s794_s9 }
  0x35   : > { %s215_s21 = sshll.u32 %s204_s24, 4  ;;  %p1306_p13 = pnand %p934_p12, %p1279_p6  ;;  %s1302_s21 = int_to_ptr.vmem [resolvable:$true] %s215_s21 }
  0x36   : > { %s1310_s28 = scalar_lea.sflag [#allocation3], %s200_s29  ;;  %s1034_s6 = scalar_lea.hbm %s1300_s14, 256 }
  0x37   : > { %p1035_p0 = scmp.ne.s32.totalorder %s1300_s14, %s1034_s6  ;;  %p1036_p3 = pneg %p1306_p13 }
  0x38   : > { %s1039_s7 = scalar_lea.hbm %s1431_s0, 1024  ;;  %p1040_p9 = scmp.lt.u32.totalorder %s1300_s14, %s1431_s0 }
  0x39   : > { %p1037_p5 = pnand %p1036_p3, %p1035_p0  ;;  %p1041_p1 = scmp.lt.u32.totalorder %s1039_s7, %s1034_s6 }
  0x3a   : > { %p1043_p4 = scmp.lt.u32.totalorder %s1034_s6, %s1300_s14 }
  0x3b   : > { %p1038_p7 = pneg %p1037_p5  ;;  %p1042_p2 = por %p1041_p1, %p1040_p9 }
  0x3d   : > { %p1044_p6 = por %p1043_p4, %p1042_p2 }
  0x3f   : > { %p1045_p8 = pnand %p1044_p6, %p1038_p7 }
  0x41   : > { %1048 = shalt.err (!%p1045_p8)
}
  0x42   : > { %s1049_s29 = scalar_lea.vmem %s1302_s21, 256  ;;  %s1155_s13 = smov [#allocation2]  }
  0x43   : > { %p1050_p12 = scmp.ne.s32.totalorder %s1302_s21, %s1049_s29  ;;  %s1054_s24 = sshll.u32 %s1155_s13, 4  ;;  %s1055_s24 = int_to_ptr.vmem [resolvable:$false] %s1054_s24 }
  0x44   : > { %s1056_s30 = scalar_lea.vmem %s1055_s24, 512  ;;  %p1057_p5 = scmp.lt.s32.totalorder %s1302_s21, %s1055_s24 }
  0x45   : > { %p1052_p10 = pnand %p1050_p12, %p1036_p3  ;;  %p1058_p9 = scmp.lt.s32.totalorder %s1056_s30, %s1049_s29 }
  0x47   : > { %p1053_p0 = pneg %p1052_p10  ;;  %p1059_p1 = por %p1058_p9, %p1057_p5 }
  0x49   : > { %p1060_p2 = pnand %p1059_p1, %p1053_p0 }
  0x4b   : > { %1063 = shalt.err (!%p1060_p2)
}
  0x4c   : > { %s1156_s6 = smov 32   ;;  %s1157_s9 = smov 2  }
  0x4d   : > { %928 = dma.hbm_to_vmem [thread:$0]  (!%p1306_p13), %s1300_s14, 256, %s1302_s21, %s1310_s28, %s1156_s6, %s1156_s6, %s1157_s9  }
  0x4e   : > { %p1450_p3 = scmp.ne.s32.totalorder %s1444_s27, 0 }
  0x4f   : > { %s1341_s7 = sand.u32 (!%p1450_p3), 1, %s1134_s16   ;;  %p1451_p7 = scmp.ne.s32.totalorder (!%p1450_p3), %s1442_s25, 0 }
  0x50   : > { %227 = sbr.rel (%p1450_p3) target bundleno = 657 (0x291), region = 36  ;;  %s798_s11 = sshll.u32 (!%p1450_p3), %s1341_s7, 4 }
  0x51   : > { %s230_s12 = scalar_lea.sflag (!%p1450_p3), [#allocation3], %s1341_s7  ;;  %s1345_s29 = scalar_lea.vmem (!%p1450_p3), [#allocation2], %s798_s11 }
  0x57   : > { %1117 = dma.done.wait (%p1451_p7), %s230_s12, 256  }
  0x58   : > { %1119 = vsyncadd (%p1451_p7), %s230_s12, 4294967040  ;;  %p1452_p13 = scmp.ne.s32.totalorder %s1440_s23, 0 }
  0x5a   : > { %1121 = dma.done.wait (%p1452_p13), [#allocation6], 2048  }
  0x5b   : > { %1123 = vsyncadd (%p1452_p13), [#allocation6], 4294965248  ;;  %v1158_v0 = vmov 0.0|0.0   ;;  %v284_v1 = vlaneseq  ;;  %vm1159_vm0 = vmmov 0   ;;  %v1160_v2 = vmov 0.0   ;;  %v274_v7 = vld [vmem:[#allocation5 + $0x20] sm:$0xff] }
  0x5c   : > { %884 = vmatprep.subr.bf16.mxu1 %v1158_v0  ;;  %896 = vmatprep.subr.bf16.mxu0 %v1158_v0  ;;  %v1161_v3 = vmov 1983009808   ;;  %v275_v8 = vld [vmem:[#allocation5 + $0x28] sm:$0xff]  ;;  %v447_v9 = vld [vmem:[#allocation5 + $0x40] sm:$0xff]  ;;  %v276_v12 = vld [vmem:[#allocation5 + $0x30] sm:$0xff]  ;;  %vm288_vm1 = vcmask 261120  }
  0x5d   : > { %848 = vmatprep.mubr.msk.f32.mxu1 %vm1159_vm0, %v1160_v2  ;;  %870 = vmatprep.mubr.msk.f32.mxu0 %vm1159_vm0, %v1160_v2  ;;  %v282_v4 = vunpack.c.l.s4 %v1161_v3  ;;  %v285_v6 = vshrl.u32 %v284_v1, 7  ;;  %v885_v10 = vpack.c.bf16 %v275_v8, %v274_v7  ;;  %v448_v11 = vld [vmem:[#allocation5 + $0x48] sm:$0xff]  ;;  %v277_v13 = vld [vmem:[#allocation5 + $0x38] sm:$0xff]  ;;  %v449_v15 = vld [vmem:[#allocation5 + $0x50] sm:$0xff]  ;;  %vm625_vm2 = vcmask 257024   ;;  %s800_s27 = sshll.u32 %s1341_s7, 2 }
  0x5e   : > { %v897_v14 = vpack.c.bf16 %v448_v11, %v447_v9  ;;  %v450_v16 = vld [vmem:[#allocation5 + $0x58] sm:$0xff]  ;;  %v888_v18 = vpack.c.bf16 %v277_v13, %v276_v12  ;;  %v1003_v21 = vld.sshfl [vmem:[%s1345_s29 + $0x2] sm:$0xf pattern:$0x76325410]  ;;  %v267_v23 = vld [vmem:[#allocation5 + $0x8] sm:$0xff] }
  0x5f   : > { %v283_v5 = vunpack.c.0.s8 %v282_v4  ;;  %886 = vmatpush3.bf16.msra.mxu1 %v885_v10  ;;  %v1002_v19 = vld.sshfl [vmem:[%s1345_s29 + $0x8] sm:$0xf pattern:$0x76325410]  ;;  %v900_v20 = vpack.c.bf16 %v450_v16, %v449_v15  ;;  %v266_v22 = vld [vmem:[#allocation5] sm:$0xff]  ;;  %v268_v27 = vld [vmem:[#allocation5 + $0x10] sm:$0xff] }
  0x60   : > { %898 = vmatpush3.bf16.msra.mxu0 %v897_v14  ;;  %887 = vmatprep.subr.bf16.mxu1 %v1158_v0  ;;  %v538_v24 = vld [vmem:[#allocation5 + $0x60] sm:$0xff]  ;;  %v539_v25 = vld [vmem:[#allocation5 + $0x68] sm:$0xff]  ;;  %v891_v26 = vpack.c.bf16 %v267_v23, %v266_v22  ;;  %v269_v29 = vld [vmem:[#allocation5 + $0x18] sm:$0xff]  ;;  %s819_s22 = sshll.u32 %s1142_s18, 6  ;;  %s261_s28 = scalar_lea.vmem [#allocation7], %s800_s27  ;;  %vm667_vm3 = vcmask 254976  }
  0x61   : > { %v1357_v17 = vsub.s32 %v283_v5, %v285_v6  ;;  %899 = vmatprep.subr.bf16.mxu0 %v1158_v0  ;;  %v903_v28 = vpack.c.bf16 %v539_v25, %v538_v24  ;;  %v540_v30 = vld [vmem:[#allocation5 + $0x70] sm:$0xff]  ;;  %v541_v31 = vld [vmem:[#allocation5 + $0x78] sm:$0xff]  ;;  %v894_v33 = vpack.c.bf16 %v269_v29, %v268_v27  ;;  %v811_v50 = vld [vmem:[%s1433_s2] ss:$0 sm:$0xff]  ;;  %s687_s13 = sshll.u32 %s261_s28, 4  ;;  %s1381_s6 = scalar_lea.hbm %s1435_s4, %s819_s22  ;;  %s1383_s13 = int_to_ptr.vmem [resolvable:$true] %s687_s13 }
  0x62   : > { %v1004_v32 = vld.sshfl [vmem:[%s1345_s29] sm:$0xf pattern:$0x76325410]  ;;  %v906_v35 = vpack.c.bf16 %v541_v31, %v540_v30  ;;  %s671_s9 = scalar_lea.sflag [#allocation4], %s1341_s7  ;;  %s1064_s18 = scalar_lea.vmem %s1383_s13, 64 }
  0x63   : > { %889 = vmatpush3.bf16.msra.mxu1 %v888_v18  ;;  %v1005_v34 = vld.sshfl [vmem:[%s1345_s29 + $0xa] sm:$0xf pattern:$0x76325410]  ;;  %v812_v53 = vld [vmem:[%s1434_s3] ss:$0 sm:$0xff]  ;;  %p1065_p4 = scmp.ne.s32.totalorder %s1383_s13, %s1064_s18 }
  0x64   : > { %901 = vmatpush3.bf16.msra.mxu0 %v900_v20  ;;  %890 = vmatprep.subr.bf16.mxu1 %v1158_v0  ;;  %s1162_s11 = smov [#allocation7]  }
  0x65   : > { %902 = vmatprep.subr.bf16.mxu0 %v1158_v0  ;;  %p1066_p6 = pnand %p1065_p4, %p1285_p11  ;;  %s1068_s12 = sshll.u32 %s1162_s11, 4  ;;  %s1069_s12 = int_to_ptr.vmem [resolvable:$false] %s1068_s12 }
  0x66   : > { %849 = vmatmul.mubr.msk.f32.vlgmr.msra.gmra.mrb[0].mxu1 %vm288_vm1, %v1002_v19  ;;  %s1070_s29 = scalar_lea.vmem %s1069_s12, 128  ;;  %p1071_p12 = scmp.lt.s32.totalorder %s1383_s13, %s1069_s12 }
  0x67   : > { %871 = vmatmul.mubr.msk.f32.vlgmr.msra.gmra.mrb[0].mxu0 %vm288_vm1, %v1003_v21  ;;  %892 = vmatpush3.bf16.msra.mxu1 %v891_v26  ;;  %p1067_p8 = pneg %p1066_p6  ;;  %p1072_p10 = scmp.lt.s32.totalorder %s1070_s29, %s1064_s18 }
  0x68   : > { %904 = vmatpush3.bf16.msra.mxu0 %v903_v28  ;;  %893 = vmatprep.subr.bf16.mxu1 %v1158_v0 }
  0x69   : > { %905 = vmatprep.subr.bf16.mxu0 %v1158_v0  ;;  %859 = vmatprep.mubr.msk.f32.mxu1 %vm1159_vm0, %v1160_v2  ;;  %p1073_p0 = por %p1072_p10, %p1071_p12 }
  0x6a   : > { %881 = vmatprep.mubr.msk.f32.mxu0 %vm1159_vm0, %v1160_v2 }
  0x6b   : > { %895 = vmatpush3.bf16.msra.mxu1 %v894_v33  ;;  %p1074_p5 = pnand %p1073_p0, %p1067_p8 }
  0x6c   : > { %907 = vmatpush3.bf16.msra.mxu0 %v906_v35 }
  0x6e   : > { %860 = vmatmul.mubr.msk.f32.vlgmr.msra.gmra.mrb[0].mxu1 %vm288_vm1, %v1004_v32 }
  0x6f   : > { %882 = vmatmul.mubr.msk.f32.vlgmr.msra.gmra.mrb[0].mxu0 %vm288_vm1, %v1005_v34 }
 0x141   : > { %v439_v36 = vpop.f32.mrb[0].mxu1 }
 0x142   : > { %v620_v37 = vpop.f32.mrb[0].mxu0  ;;  %v861_v38 = vpop.f32.mrb[1].mxu1 }
 0x143   : > { %v908_v39 = vadd.f32 %v620_v37, %v439_v36  ;;  %v883_v40 = vpop.f32.mrb[1].mxu0 }
 0x145   : > { %v626_v41 = vsel %vm625_vm2, %v908_v39, 0.0 }
 0x146   : > { %627 = vadd.xlane.f32.xlu0 %v626_v41 }
 0x1d3   : > { %v628_v42 = vpop.xlane.xlu0 %627 }
 0x1d4   : > { %v630_v43 = vmul.f32 0.03125, %v628_v42 }
 0x1d6   : > { %v631_v44 = vsub.f32 %v908_v39, %v630_v43 }
 0x1d8   : > { %v632_v45 = vmul.f32 %v631_v44, %v631_v44 }
 0x1da   : > { %v633_v46 = vsel %vm625_vm2, %v632_v45, 0.0 }
 0x1db   : > { %634 = vadd.xlane.f32.xlu0 %v633_v46 }
 0x268   : > { %v635_v47 = vpop.xlane.xlu0 %634 }
 0x269   : > { %v636_v48 = vmul.f32 0.03125, %v635_v47 }
 0x26b   : > { %v637_v49 = vadd.f32 1e-05, %v636_v48 }
 0x26d   : > { %1000 = vrsqrt.f32 %v637_v49 }
 0x277   : > { %v1001_v51 = vpop.eup %1000 }
 0x278   : > { %v646_v52 = vmul.f32 %v1001_v51, %v811_v50 }
 0x27a   : > { %v647_v54 = vmul.f32 %v646_v52, %v631_v44 }
 0x27c   : > { %v655_v55 = vadd.f32 %v812_v53, %v647_v54 }
 0x27e   : > { %v663_v56 = vrot.slane %v655_v55, %v1357_v17 }
 0x280   : > { %v664_v57 = vcombine.high %v663_v56, %v663_v56  ;;  %668 = vst.msk [vmem:[%s261_s28] sm:$0x3] %vm667_vm3, %v663_v56 }
 0x282   : > { %669 = vst.msk [vmem:[%s261_s28 + $0x2] sm:$0x3] %vm667_vm3, %v664_v57 }
 0x283   : > { %1077 = shalt.err (!%p1074_p5)
}
 0x284   : > { %s1078_s23 = scalar_lea.hbm %s1381_s6, 64  ;;  %s1082_s14 = scalar_lea.hbm %s1435_s4, 256 }
 0x285   : > { %p1079_p9 = scmp.ne.s32.totalorder %s1381_s6, %s1078_s23  ;;  %p1083_p3 = scmp.lt.u32.totalorder %s1381_s6, %s1435_s4 }
 0x286   : > { %p1084_p7 = scmp.lt.u32.totalorder %s1082_s14, %s1078_s23  ;;  %p1086_p4 = scmp.lt.u32.totalorder %s1078_s23, %s1381_s6 }
 0x287   : > { %p1080_p1 = pnand %p1079_p9, %p1285_p11 }
 0x288   : > { %p1085_p13 = por %p1084_p7, %p1083_p3 }
 0x289   : > { %p1081_p2 = pneg %p1080_p1 }
 0x28a   : > { %p1087_p6 = por %p1086_p4, %p1085_p13 }
 0x28c   : > { %p1088_p8 = pnand %p1087_p6, %p1081_p2 }
 0x28e   : > { %1091 = shalt.err (!%p1088_p8)
}
 0x28f   : > { %s1163_s28 = smov 32   ;;  %s1164_s24 = smov 2  }
 0x290   : > { %919 = dma.vmem_to_hbm [thread:$0]  (%p1285_p11), %s1383_s13, 64, %s1381_s6, %s671_s9, %s1163_s28, %s1163_s28, %s1164_s24  }
 0x291 PF: > { %p936_p12 = scmp.ge.s32.totalorder %s1150_s20, 2  ;;  %s702_s30 = sand.u32 1, %s1130_s15  }
 0x292   : > { %p1453_p10 = scmp.ne.s32.totalorder %s1443_s26, 0  ;;  %s703_s18 = scalar_lea.sflag [#allocation4], %s702_s30 }
 0x294   : > { %p930_p0 = pnand %p936_p12, %p1453_p10 }
 0x296   : > { %1125 = dma.done.wait (!%p930_p0), %s703_s18, 64  }
 0x297   : > { %1127 = vsyncadd (!%p930_p0), %s703_s18, 4294967232  ;;  %s21_s20 = sadd.s32 1, %s1150_s20   ;;  %s1454_s15 = smov %s1134_s16 }
 0x298   : > { %p18_p5 = scmp.ge.s32.totalorder %s21_s20, 6   ;;  %s1455_s16 = smov %s1138_s17 }
 0x299   : > { %s1456_s17 = smov %s1294_s10  ;;  %s1457_s18 = smov %s1146_s19 }
 0x29a   : > { %s1458_s19 = smov %s1460_s5  ;;  %20 = sbr.rel (!%p18_p5) target bundleno = 7 (0x7), region = 91 }
 0x2a1   :  { %708 = vsyncpa [#allocation3], 1 }
 0x2a2   :  { %710 = vsyncpa [#allocation3 + $0x1], 1 }
 0x2a3   :  { %711 = vsyncpa [#allocation6], 1 }
 0x2a4   :  { %712 = vsyncpa [#allocation4], 1 }
 0x2a5   :  { %714 = vsyncpa [#allocation4 + $0x1], 1 }

</bundles_post_ra>
